<compile_context>
chip_gen: v7x
topology: tpu7x:2x2x1
jax: 0.10.0
libtpu: 0.0.40
codegen_flags: <defaults>
</compile_context>

<pallas_src>
import jax
import jax.numpy as jnp
from jax import lax
from jax.experimental import pallas as pl
from jax.experimental.pallas import tpu as pltpu

# -------- synthetic sizes (small, consistent with the module) --------
BATCH = 16            # batch
IMG_DIM = 64          # "ViT pooler" embedding size
TXT_DIM = 32          # "BERT pooler" embedding size
TRANS_DIM = 32        # 'smallest' -> min(IMG_DIM, TXT_DIM)
HIDDEN = 32           # config.hidden_size
HEAD_OUT = TRANS_DIM  # use_answer_embeddings -> head outputs text_embedding_size
NUM_ANSWERS = 16

LANES = 128           # lane-pad every feature axis to one full vreg width
MAX_BLOCK_B = 256     # rows per grid step for large batches (full MXU passes)


def vqa_kernel(x_ref, w1_ref, b1_ref, w2_ref, b2_ref, wha_ref, bha_ref, out_ref):
    # x = [image_transform-folded | question_transform-folded] input, lane-padded.
    x = x_ref[...]

    # hidden layer 1 (input transforms + concat already folded into w1/b1)
    h1 = jnp.dot(x, w1_ref[...], preferred_element_type=jnp.float32) + b1_ref[...]
    h1 = jnp.maximum(h1, 0.0)                                     # ReLU

    # hidden layer 2
    h2 = jnp.dot(h1, w2_ref[...], preferred_element_type=jnp.float32) + b2_ref[...]
    h2 = jnp.maximum(h2, 0.0)                                     # ReLU

    # fused head + answer matmul (single MXU pass):
    #   columns [0, NUM_ANSWERS)                      -> raw logits  = head @ ans.T
    #   columns [NUM_ANSWERS, NUM_ANSWERS + HEAD_OUT) -> head        = h2 @ wh.T + bh
    #   remaining columns are zero.
    fused = jnp.dot(h2, wha_ref[...], preferred_element_type=jnp.float32) + bha_ref[...]

    # per-row L2-norm of the head columns only (lane mask avoids sub-tile slicing)
    col = lax.broadcasted_iota(jnp.int32, fused.shape, 1)
    head_mask = jnp.logical_and(col >= NUM_ANSWERS, col < NUM_ANSWERS + HEAD_OUT)
    sumsq = jnp.sum(jnp.where(head_mask, fused * fused, 0.0), axis=1, keepdims=True)
    scale = lax.rsqrt(jnp.maximum(sumsq, 1e-24))                  # = 1/max(||head||,1e-12)

    # final logits live in the first NUM_ANSWERS lanes; the scaled head columns are
    # dead weight that the wrapper slices off (output stays lane-dense / unmasked).
    out_ref[...] = fused * scale


def _pad2(a, rows, cols):
    """Zero-pad a 2-D array to (rows, cols)."""
    out = jnp.zeros((rows, cols), jnp.float32)
    return out.at[:a.shape[0], :a.shape[1]].set(a.astype(jnp.float32))


def _round_up(x, m):
    return ((x + m - 1) // m) * m


def vqa_forward(img, q, params):
    (wi, bi, wq, bq, w1, b1, w2, b2, wh, bh, ans) = params
    B = img.shape[0]

    # ---- batch tiling: one big block for small batches, 256-row blocks at scale ----
    block_b = min(_round_up(B, 8), MAX_BLOCK_B)
    b_pad = _round_up(B, block_b)
    n_steps = b_pad // block_b
    # only split across TensorCores when each step is a full (>=128-row) MXU pass
    semantics = ("parallel",) if (n_steps > 1 and block_b >= 128) else ("arbitrary",)

    # ---- trace-time weight prep (fp reassociation; verified vs reference) ----
    w1_t = w1.T                                # (TRANS_DIM + TRANS_DIM, HIDDEN)
    w1a = w1_t[:TRANS_DIM, :]                  # image half
    w1b = w1_t[TRANS_DIM:, :]                  # question half
    # fold the (purely linear) input transforms into layer 1
    w1_img = wi.T @ w1a                        # (IMG_DIM, HIDDEN)
    w1_txt = wq.T @ w1b                        # (TXT_DIM, HIDDEN)
    w1_fused = jnp.concatenate([w1_img, w1_txt], axis=0)          # (IMG+TXT, HIDDEN)
    b1_fused = bi @ w1a + bq @ w1b + b1                           # (HIDDEN,)

    # fuse head + answer projection into one weight: [wh.T @ ans.T | wh.T]
    wh_t = wh.T                                                   # (HIDDEN, HEAD_OUT)
    w_ha = jnp.concatenate([wh_t @ ans.T, wh_t], axis=1)          # (HIDDEN, NA+HEAD_OUT)
    b_ha = jnp.concatenate([bh @ ans.T, bh], axis=0)              # (NA+HEAD_OUT,)

    # ---- pad rows to the block multiple and every feature axis to 128 lanes ----
    x = jnp.concatenate([img, q], axis=1)                         # (B, IMG+TXT)
    x_p   = _pad2(x, b_pad, LANES)
    w1_p  = _pad2(w1_fused, LANES, LANES)
    w2_p  = _pad2(w2.T, LANES, LANES)
    wha_p = _pad2(w_ha, LANES, LANES)
    b1_p  = _pad2(b1_fused.reshape(1, -1), 1, LANES)
    b2_p  = _pad2(b2.reshape(1, -1), 1, LANES)
    bha_p = _pad2(b_ha.reshape(1, -1), 1, LANES)

    row_spec = pl.BlockSpec((block_b, LANES), lambda i: (i, 0))   # batch tiles
    w_spec = pl.BlockSpec((LANES, LANES), lambda i: (0, 0))       # weights resident
    b_spec = pl.BlockSpec((1, LANES), lambda i: (0, 0))           # bias rows resident

    out_p = pl.pallas_call(
        vqa_kernel,
        out_shape=jax.ShapeDtypeStruct((b_pad, LANES), jnp.float32),
        grid=(n_steps,),
        in_specs=[row_spec,
                  w_spec, b_spec,
                  w_spec, b_spec,
                  w_spec, b_spec],
        out_specs=row_spec,
        compiler_params=pltpu.CompilerParams(
            dimension_semantics=semantics),
    )(x_p, w1_p, b1_p, w2_p, b2_p, wha_p, bha_p)

    # drop padded rows and the non-logit columns.
    # TODO(synk): at large B a downstream consumer should read the padded (B,128)
    # slab directly (or fold this slice into its first op) to avoid an extra HBM pass.
    return out_p[:B, :NUM_ANSWERS]


def reference_forward(img, q, params):
    (wi, bi, wq, bq, w1, b1, w2, b2, wh, bh, ans) = params
    img_t = img @ wi.T + bi
    q_t = q @ wq.T + bq
    emb = jnp.concatenate([img_t, q_t], axis=1)
    h = jnp.maximum(emb @ w1.T + b1, 0.0)
    h = jnp.maximum(h @ w2.T + b2, 0.0)
    head = h @ wh.T + bh
    head_n = head / jnp.maximum(
        jnp.sqrt(jnp.sum(head * head, axis=1, keepdims=True)), 1e-12)
    return head_n @ ans.T


def init_params(key):
    ks = jax.random.split(key, 12)
    def lin(k, out_d, in_d, scale=0.1):
        kw, kb = jax.random.split(k)
        w = scale * jax.random.normal(kw, (out_d, in_d), jnp.float32)
        b = scale * jax.random.normal(kb, (out_d,), jnp.float32)
        return w, b
    wi, bi = lin(ks[0], TRANS_DIM, IMG_DIM)                    # image_transform
    wq, bq = lin(ks[1], TRANS_DIM, TXT_DIM)                    # question_transform
    w1, b1 = lin(ks[2], HIDDEN, TRANS_DIM + TRANS_DIM)         # hidden layer 1
    w2, b2 = lin(ks[3], HIDDEN, HIDDEN)                        # hidden layer 2
    wh, bh = lin(ks[4], HEAD_OUT, HIDDEN)                      # head
    # synthetic answer embeddings (stands in for BERT pooler outputs), L2-normalized
    # rows as in recompute_answer_embeddings (F.normalize path).
    ans_raw = jax.random.normal(ks[5], (NUM_ANSWERS, HEAD_OUT), jnp.float32)
    ans = ans_raw / jnp.maximum(
        jnp.sqrt(jnp.sum(ans_raw * ans_raw, axis=1, keepdims=True)), 1e-12)
    return (wi, bi, wq, bq, w1, b1, w2, b2, wh, bh, ans)
    # TODO(synk): finetune_from_snapshot=True path (full BERT/ViT encoders) and the
    # tokenizer-based recompute_answer_embeddings are out of scope for a single
    # kernel; precomputed embeddings are used instead.


if __name__ == "__main__":
    key = jax.random.PRNGKey(0)
    k_img, k_q, k_par = jax.random.split(key, 3)
    img = jax.random.normal(k_img, (BATCH, IMG_DIM), jnp.float32)
    q = jax.random.normal(k_q, (BATCH, TXT_DIM), jnp.float32)
    params = init_params(k_par)

    out = vqa_forward(img, q, params)
    jax.block_until_ready(out)

    ref = reference_forward(img, q, params)
    assert out.shape == (BATCH, NUM_ANSWERS)
    assert jnp.allclose(out, ref, atol=1e-4, rtol=1e-4), "mismatch vs. reference"
    print("KERNEL_OK")
</pallas_src>

<mosaic_0001>
module attributes {stable_mosaic.version = 11 : i64} {
  func.func @vqa_kernel(%arg0: i32, %arg1: memref<16x128xf32, #tpu.memory_space<vmem>>, %arg2: memref<128x128xf32, #tpu.memory_space<vmem>>, %arg3: memref<1x128xf32, #tpu.memory_space<vmem>>, %arg4: memref<128x128xf32, #tpu.memory_space<vmem>>, %arg5: memref<1x128xf32, #tpu.memory_space<vmem>>, %arg6: memref<128x128xf32, #tpu.memory_space<vmem>>, %arg7: memref<1x128xf32, #tpu.memory_space<vmem>>, %arg8: memref<16x128xf32, #tpu.memory_space<vmem>>) attributes {dimension_semantics = [#tpu.dimension_semantics<arbitrary>], iteration_bounds = array<i64: 1>, scalar_prefetch = 0 : i64, scratch_operands = 0 : i64, tpu.core_type = #tpu.core_type<tc>, window_params = [{transform_indices = @transform_0, window_bounds = array<i64: 16, 128>}, {pipeline_mode = #tpu.pipeline_mode<synchronous>, transform_indices = @transform_1, window_bounds = array<i64: 128, 128>}, {pipeline_mode = #tpu.pipeline_mode<synchronous>, transform_indices = @transform_2, window_bounds = array<i64: 1, 128>}, {pipeline_mode = #tpu.pipeline_mode<synchronous>, transform_indices = @transform_3, window_bounds = array<i64: 128, 128>}, {pipeline_mode = #tpu.pipeline_mode<synchronous>, transform_indices = @transform_4, window_bounds = array<i64: 1, 128>}, {pipeline_mode = #tpu.pipeline_mode<synchronous>, transform_indices = @transform_5, window_bounds = array<i64: 128, 128>}, {pipeline_mode = #tpu.pipeline_mode<synchronous>, transform_indices = @transform_6, window_bounds = array<i64: 1, 128>}, {transform_indices = @transform_7, window_bounds = array<i64: 16, 128>}]} {
    %c0 = arith.constant 0 : index
    %c0_0 = arith.constant 0 : index
    %0 = vector.load %arg1[%c0, %c0_0] : memref<16x128xf32, #tpu.memory_space<vmem>>, vector<16x128xf32>
    %c0_1 = arith.constant 0 : index
    %c0_2 = arith.constant 0 : index
    %1 = vector.load %arg2[%c0_1, %c0_2] : memref<128x128xf32, #tpu.memory_space<vmem>>, vector<128x128xf32>
    %cst = arith.constant dense<0.000000e+00> : vector<16x128xf32>
    %2 = tpu.matmul %0, %1, %cst {dimension_numbers = #tpu.dot_dimension_numbers<[1], [0], [0], [1], [0, 0, 1, 1], [], []>} : vector<16x128xf32>, vector<128x128xf32>, vector<16x128xf32> -> vector<16x128xf32>
    %c0_3 = arith.constant 0 : index
    %c0_4 = arith.constant 0 : index
    %3 = vector.load %arg3[%c0_3, %c0_4] : memref<1x128xf32, #tpu.memory_space<vmem>>, vector<1x128xf32>
    %4 = vector.broadcast %3 : vector<1x128xf32> to vector<16x128xf32>
    %5 = arith.addf %2, %4 : vector<16x128xf32>
    %cst_5 = arith.constant 0.000000e+00 : f32
    %6 = vector.broadcast %cst_5 : f32 to vector<16x128xf32>
    %7 = arith.maximumf %5, %6 : vector<16x128xf32>
    %c0_6 = arith.constant 0 : index
    %c0_7 = arith.constant 0 : index
    %8 = vector.load %arg4[%c0_6, %c0_7] : memref<128x128xf32, #tpu.memory_space<vmem>>, vector<128x128xf32>
    %cst_8 = arith.constant dense<0.000000e+00> : vector<16x128xf32>
    %9 = tpu.matmul %7, %8, %cst_8 {dimension_numbers = #tpu.dot_dimension_numbers<[1], [0], [0], [1], [0, 0, 1, 1], [], []>} : vector<16x128xf32>, vector<128x128xf32>, vector<16x128xf32> -> vector<16x128xf32>
    %c0_9 = arith.constant 0 : index
    %c0_10 = arith.constant 0 : index
    %10 = vector.load %arg5[%c0_9, %c0_10] : memref<1x128xf32, #tpu.memory_space<vmem>>, vector<1x128xf32>
    %11 = vector.broadcast %10 : vector<1x128xf32> to vector<16x128xf32>
    %12 = arith.addf %9, %11 : vector<16x128xf32>
    %cst_11 = arith.constant 0.000000e+00 : f32
    %13 = vector.broadcast %cst_11 : f32 to vector<16x128xf32>
    %14 = arith.maximumf %12, %13 : vector<16x128xf32>
    %c0_12 = arith.constant 0 : index
    %c0_13 = arith.constant 0 : index
    %15 = vector.load %arg6[%c0_12, %c0_13] : memref<128x128xf32, #tpu.memory_space<vmem>>, vector<128x128xf32>
    %cst_14 = arith.constant dense<0.000000e+00> : vector<16x128xf32>
    %16 = tpu.matmul %14, %15, %cst_14 {dimension_numbers = #tpu.dot_dimension_numbers<[1], [0], [0], [1], [0, 0, 1, 1], [], []>} : vector<16x128xf32>, vector<128x128xf32>, vector<16x128xf32> -> vector<16x128xf32>
    %c0_15 = arith.constant 0 : index
    %c0_16 = arith.constant 0 : index
    %17 = vector.load %arg7[%c0_15, %c0_16] : memref<1x128xf32, #tpu.memory_space<vmem>>, vector<1x128xf32>
    %18 = vector.broadcast %17 : vector<1x128xf32> to vector<16x128xf32>
    %19 = arith.addf %16, %18 : vector<16x128xf32>
    %20 = tpu.iota {dimensions = array<i32: 1>} : vector<16x128xi32>
    %c16_i32 = arith.constant 16 : i32
    %21 = vector.broadcast %c16_i32 : i32 to vector<16x128xi32>
    %22 = arith.cmpi sge, %20, %21 : vector<16x128xi32>
    %c48_i32 = arith.constant 48 : i32
    %23 = vector.broadcast %c48_i32 : i32 to vector<16x128xi32>
    %24 = arith.cmpi slt, %20, %23 : vector<16x128xi32>
    %25 = arith.andi %22, %24 : vector<16x128xi1>
    %26 = arith.mulf %19, %19 : vector<16x128xf32>
    %cst_17 = arith.constant 0.000000e+00 : f32
    %27 = vector.broadcast %cst_17 : f32 to vector<16x128xf32>
    %28 = arith.select %25, %26, %27 : vector<16x128xi1>, vector<16x128xf32>
    %cst_18 = arith.constant dense<0.000000e+00> : vector<16xf32>
    %29 = vector.multi_reduction <add>, %28, %cst_18 [1] : vector<16x128xf32> to vector<16xf32>
    %30 = vector.shape_cast %29 : vector<16xf32> to vector<16x1xf32>
    %cst_19 = arith.constant 1.000000e-24 : f32
    %31 = vector.broadcast %cst_19 : f32 to vector<16x1xf32>
    %32 = arith.maximumf %30, %31 : vector<16x1xf32>
    %33 = math.rsqrt %32 : vector<16x1xf32>
    %34 = vector.broadcast %33 : vector<16x1xf32> to vector<16x128xf32>
    %35 = arith.mulf %19, %34 : vector<16x128xf32>
    %c0_20 = arith.constant 0 : index
    %c0_21 = arith.constant 0 : index
    %36 = vector.load %arg8[%c0_20, %c0_21] : memref<16x128xf32, #tpu.memory_space<vmem>>, vector<16x128xf32>
    tpu.vector_store %arg8[%c0_20, %c0_21], %35 {strides = array<i32>} : memref<16x128xf32, #tpu.memory_space<vmem>>, vector<16x128xf32>,
    return
  }
  func.func @transform_0(%arg0: i32) -> (i32, i32) {
    %c0_i32 = arith.constant 0 : i32
    %c0_i32_0 = arith.constant 0 : i32
    return %arg0, %c0_i32 : i32, i32
  }
  func.func @transform_1(%arg0: i32) -> (i32, i32) {
    %c0_i32 = arith.constant 0 : i32
    %c0_i32_0 = arith.constant 0 : i32
    %c0_i32_1 = arith.constant 0 : i32
    return %c0_i32, %c0_i32_0 : i32, i32
  }
  func.func @transform_2(%arg0: i32) -> (i32, i32) {
    %c0_i32 = arith.constant 0 : i32
    %c0_i32_0 = arith.constant 0 : i32
    %c0_i32_1 = arith.constant 0 : i32
    return %c0_i32, %c0_i32_0 : i32, i32
  }
  func.func @transform_3(%arg0: i32) -> (i32, i32) {
    %c0_i32 = arith.constant 0 : i32
    %c0_i32_0 = arith.constant 0 : i32
    %c0_i32_1 = arith.constant 0 : i32
    return %c0_i32, %c0_i32_0 : i32, i32
  }
  func.func @transform_4(%arg0: i32) -> (i32, i32) {
    %c0_i32 = arith.constant 0 : i32
    %c0_i32_0 = arith.constant 0 : i32
    %c0_i32_1 = arith.constant 0 : i32
    return %c0_i32, %c0_i32_0 : i32, i32
  }
  func.func @transform_5(%arg0: i32) -> (i32, i32) {
    %c0_i32 = arith.constant 0 : i32
    %c0_i32_0 = arith.constant 0 : i32
    %c0_i32_1 = arith.constant 0 : i32
    return %c0_i32, %c0_i32_0 : i32, i32
  }
  func.func @transform_6(%arg0: i32) -> (i32, i32) {
    %c0_i32 = arith.constant 0 : i32
    %c0_i32_0 = arith.constant 0 : i32
    %c0_i32_1 = arith.constant 0 : i32
    return %c0_i32, %c0_i32_0 : i32, i32
  }
  func.func @transform_7(%arg0: i32) -> (i32, i32) {
    %c0_i32 = arith.constant 0 : i32
    %c0_i32_0 = arith.constant 0 : i32
    return %arg0, %c0_i32 : i32, i32
  }
}

</mosaic_0001>

<bundles_post_ra>
// kernel: tpu_custom_call.1
= control target key start
LH: loop header
LB: loop body
LE: loop exit
PB: predicated region body
PF: predicated region fallthrough
CT: control target
= control target key end

     0   :  { %12 = vsyncpa [#allocation3], 0  ;;  %s954_s0 = inlined_call_operand.hbm [shape: f32[16,128], index: 0, kind: input, shape index: {}]   ;;  %s955_s1 = inlined_call_operand.hbm [shape: f32[128,128], index: 1, kind: input, shape index: {}]   ;;  %s956_s2 = inlined_call_operand.vmem [shape: f32[1,128], index: 2, kind: input, shape index: {}]   ;;  %s957_s3 = inlined_call_operand.hbm [shape: f32[128,128], index: 3, kind: input, shape index: {}]   ;;  %s958_s4 = inlined_call_operand.vmem [shape: f32[1,128], index: 4, kind: input, shape index: {}]   ;;  %s959_s5 = inlined_call_operand.hbm [shape: f32[128,128], index: 5, kind: input, shape index: {}]   ;;  %s960_s6 = inlined_call_operand.vmem [shape: f32[1,128], index: 6, kind: input, shape index: {}]   ;;  %s961_s7 = inlined_call_operand.hbm [shape: f32[16,128], index: 7, kind: output, shape index: {}]  }
   0x1   :  { %13 = vsyncpa [#allocation6], 0 }
   0x2   :  { %14 = vsyncpa [#allocation9], 0 }
   0x3   :  { %15 = vsyncpa [#allocation4], 0  ;;  %s809_s24 = smov [#allocation5]   ;;  %s810_s26 = smov [#allocation2]  }
   0x4   :  { %s33_s25 = sshll.u32 %s809_s24, 4  ;;  %s21_s27 = sshll.u32 %s810_s26, 4  ;;  %s34_s25 = int_to_ptr.vmem [resolvable:$true] %s33_s25  ;;  %s856_s27 = int_to_ptr.vmem [resolvable:$true] %s21_s27 }
   0x5   :  { %s691_s30 = scalar_lea.hbm %s955_s1, 2048 }
   0x6   :  { %p692_p0 = scmp.ne.s32.totalorder %s955_s1, %s691_s30  ;;  %p695_p1 = scmp.lt.u32.totalorder %s691_s30, %s955_s1 }
   0x8   :  { %p697_p2 = pnand %p695_p1, %p692_p0 }
   0xa   :  { %700 = shalt.err (!%p697_p2)
}
   0xb   :  { %s701_s12 = scalar_lea.vmem %s34_s25, 2048  ;;  %p706_p4 = scmp.lt.s32.totalorder %s34_s25, %s34_s25 }
   0xc   :  { %p702_p3 = scmp.ne.s32.totalorder %s34_s25, %s701_s12  ;;  %p707_p5 = scmp.lt.s32.totalorder %s701_s12, %s701_s12 }
   0xe   :  { %p708_p6 = por %p707_p5, %p706_p4 }
  0x10   :  { %p709_p7 = pnand %p708_p6, %p702_p3 }
  0x12   :  { %712 = shalt.err (!%p709_p7)
}
  0x13   :  { %s811_s13 = smov 128   ;;  %s812_s14 = smov 8  }
  0x14   :  { %39 = dma.hbm_to_vmem [thread:$0]  %s955_s1, 2048, %s34_s25, [#allocation6], %s811_s13, %s811_s13, %s812_s14  }
  0x15   :  { %s713_s19 = scalar_lea.hbm %s954_s0, 256 }
  0x16   :  { %p714_p8 = scmp.ne.s32.totalorder %s954_s0, %s713_s19  ;;  %p717_p9 = scmp.lt.u32.totalorder %s713_s19, %s954_s0 }
  0x18   :  { %p719_p10 = pnand %p717_p9, %p714_p8 }
  0x1a   :  { %722 = shalt.err (!%p719_p10)
}
  0x1b   :  { %s723_s24 = scalar_lea.vmem %s856_s27, 256  ;;  %p728_p12 = scmp.lt.s32.totalorder %s856_s27, %s856_s27 }
  0x1c   :  { %p724_p11 = scmp.ne.s32.totalorder %s856_s27, %s723_s24  ;;  %p729_p13 = scmp.lt.s32.totalorder %s723_s24, %s723_s24 }
  0x1e   :  { %p730_p0 = por %p729_p13, %p728_p12 }
  0x20   :  { %p731_p1 = pnand %p730_p0, %p724_p11 }
  0x22   :  { %734 = shalt.err (!%p731_p1)
}
  0x23   :  { %27 = dma.hbm_to_vmem [thread:$0]  %s954_s0, 256, %s856_s27, [#allocation3], %s811_s13, %s811_s13, %s812_s14  }
  0x24   :  { %s813_s26 = smov [#allocation7]   ;;  %s814_s29 = smov [#allocation8]  }
  0x25   :  { %s47_s28 = sshll.u32 %s813_s26, 4  ;;  %s61_s30 = sshll.u32 %s814_s29, 4  ;;  %s48_s28 = int_to_ptr.vmem [resolvable:$true] %s47_s28  ;;  %s893_s30 = int_to_ptr.vmem [resolvable:$true] %s61_s30 }
  0x26   :  { %s735_s10 = scalar_lea.hbm %s957_s3, 2048 }
  0x27   :  { %p736_p2 = scmp.ne.s32.totalorder %s957_s3, %s735_s10  ;;  %p739_p3 = scmp.lt.u32.totalorder %s735_s10, %s957_s3 }
  0x29   :  { %p741_p4 = pnand %p739_p3, %p736_p2 }
  0x2b   :  { %744 = shalt.err (!%p741_p4)
}
  0x2c   :  { %s745_s0 = scalar_lea.vmem %s48_s28, 2048  ;;  %p750_p6 = scmp.lt.s32.totalorder %s48_s28, %s48_s28 }
  0x2d   :  { %p746_p5 = scmp.ne.s32.totalorder %s48_s28, %s745_s0  ;;  %p751_p7 = scmp.lt.s32.totalorder %s745_s0, %s745_s0 }
  0x2f   :  { %p752_p8 = por %p751_p7, %p750_p6 }
  0x31   :  { %p753_p9 = pnand %p752_p8, %p746_p5 }
  0x33   :  { %756 = shalt.err (!%p753_p9)
}
  0x34   :  { %53 = dma.hbm_to_vmem [thread:$0]  %s957_s3, 2048, %s48_s28, [#allocation6], %s811_s13, %s811_s13, %s812_s14  }
  0x35   :  { %s757_s20 = scalar_lea.hbm %s959_s5, 2048 }
  0x36   :  { %p758_p10 = scmp.ne.s32.totalorder %s959_s5, %s757_s20  ;;  %p761_p11 = scmp.lt.u32.totalorder %s757_s20, %s959_s5 }
  0x38   :  { %p763_p12 = pnand %p761_p11, %p758_p10 }
  0x3a   :  { %766 = shalt.err (!%p763_p12)
}
  0x3b   :  { %s767_s1 = scalar_lea.vmem %s893_s30, 2048  ;;  %p772_p0 = scmp.lt.s32.totalorder %s893_s30, %s893_s30 }
  0x3c   :  { %p768_p13 = scmp.ne.s32.totalorder %s893_s30, %s767_s1  ;;  %p773_p1 = scmp.lt.s32.totalorder %s767_s1, %s767_s1 }
  0x3e   :  { %p774_p2 = por %p773_p1, %p772_p0 }
  0x40   :  { %p775_p3 = pnand %p774_p2, %p768_p13 }
  0x42   :  { %778 = shalt.err (!%p775_p3)
}
  0x43   :  { %67 = dma.hbm_to_vmem [thread:$0]  %s959_s5, 2048, %s893_s30, [#allocation9], %s811_s13, %s811_s13, %s812_s14  }
  0x44   :  { %801 = dma.done.wait [#allocation3], 256  }
  0x45   :  { %802 = vsyncadd [#allocation3], 4294967040 }
  0x46   :  { %803 = dma.done.wait [#allocation6], 4096  }
  0x47   :  { %804 = vsyncadd [#allocation6], 4294963200 }
  0x48   :  { %805 = dma.done.wait [#allocation9], 2048  }
  0x49   :  { %806 = vsyncadd [#allocation9], 4294965248  ;;  %v84_v0 = vld [vmem:[#allocation5] sm:$0xff]  ;;  %v85_v1 = vld [vmem:[#allocation5 + $0x8] sm:$0xff] }
  0x4a   :  { %v86_v2 = vld [vmem:[#allocation5 + $0x10] sm:$0xff]  ;;  %v584_v3 = vpack.c.bf16 %v85_v1, %v84_v0  ;;  %v87_v4 = vld [vmem:[#allocation5 + $0x18] sm:$0xff]  ;;  %v88_v6 = vld [vmem:[#allocation5 + $0x20] sm:$0xff] }
  0x4b   :  { %v588_v5 = vpack.c.bf16 %v87_v4, %v86_v2  ;;  %v89_v7 = vld [vmem:[#allocation5 + $0x28] sm:$0xff]  ;;  %v90_v9 = vld [vmem:[#allocation5 + $0x30] sm:$0xff]  ;;  %v91_v10 = vld [vmem:[#allocation5 + $0x38] sm:$0xff] }
  0x4c   :  { %585 = vmatprep.subr.bf16.mxu0 %v584_v3  ;;  %v592_v8 = vpack.c.bf16 %v89_v7, %v88_v6  ;;  %v82_v11 = vld [vmem:[#allocation2] sm:$0xff]  ;;  %v184_v12 = vld [vmem:[#allocation7] sm:$0xff]  ;;  %v185_v13 = vld [vmem:[#allocation7 + $0x8] sm:$0xff]  ;;  %v596_v20 = vpack.c.bf16 %v91_v10, %v90_v9 }
  0x4d   :  { %587 = vmatpush3.bf16.msra.mxu0 %v584_v3  ;;  %511 = vmatprep.mubr.f32.mxu0 %v82_v11  ;;  %v186_v14 = vld [vmem:[#allocation7 + $0x10] sm:$0xff]  ;;  %v616_v15 = vpack.c.bf16 %v185_v13, %v184_v12  ;;  %v187_v16 = vld [vmem:[#allocation7 + $0x18] sm:$0xff]  ;;  %v188_v18 = vld [vmem:[#allocation7 + $0x20] sm:$0xff] }
  0x4e   :  { %589 = vmatprep.subr.bf16.mxu0 %v588_v5  ;;  %v620_v17 = vpack.c.bf16 %v187_v16, %v186_v14  ;;  %v189_v19 = vld [vmem:[#allocation7 + $0x28] sm:$0xff]  ;;  %v92_v21 = vld [vmem:[#allocation5 + $0x40] sm:$0xff]  ;;  %v190_v24 = vld [vmem:[#allocation7 + $0x30] sm:$0xff] }
  0x4f   :  { %617 = vmatprep.subr.bf16.mxu1 %v616_v15  ;;  %v93_v22 = vld [vmem:[#allocation5 + $0x48] sm:$0xff]  ;;  %v624_v23 = vpack.c.bf16 %v189_v19, %v188_v18  ;;  %v191_v25 = vld [vmem:[#allocation7 + $0x38] sm:$0xff]  ;;  %v94_v27 = vld [vmem:[#allocation5 + $0x50] sm:$0xff] }
  0x50   :  { %619 = vmatpush3.bf16.msra.mxu1 %v616_v15  ;;  %v600_v26 = vpack.c.bf16 %v93_v22, %v92_v21  ;;  %v95_v28 = vld [vmem:[#allocation5 + $0x58] sm:$0xff]  ;;  %v628_v29 = vpack.c.bf16 %v191_v25, %v190_v24  ;;  %v192_v30 = vld [vmem:[#allocation7 + $0x40] sm:$0xff]  ;;  %v193_v31 = vld [vmem:[#allocation7 + $0x48] sm:$0xff]  ;;  %v382_v24 = vlaneseq }
  0x51   :  { %591 = vmatpush3.bf16.msra.mxu0 %v588_v5  ;;  %621 = vmatprep.subr.bf16.mxu1 %v620_v17  ;;  %v604_v32 = vpack.c.bf16 %v95_v28, %v94_v27  ;;  %v96_v33 = vld [vmem:[#allocation5 + $0x60] sm:$0xff]  ;;  %v97_v34 = vld [vmem:[#allocation5 + $0x68] sm:$0xff]  ;;  %v632_v35 = vpack.c.bf16 %v193_v31, %v192_v30  ;;  %v194_v36 = vld [vmem:[#allocation7 + $0x50] sm:$0xff] }
  0x52   :  { %593 = vmatprep.subr.bf16.mxu0 %v592_v8  ;;  %v195_v37 = vld [vmem:[#allocation7 + $0x58] sm:$0xff]  ;;  %v608_v38 = vpack.c.bf16 %v97_v34, %v96_v33  ;;  %v98_v39 = vld [vmem:[#allocation5 + $0x70] sm:$0xff]  ;;  %v196_v42 = vld [vmem:[#allocation7 + $0x60] sm:$0xff]  ;;  %v383_v25 = vand.u32 127, %v382_v24 }
  0x53   :  { %v99_v40 = vld [vmem:[#allocation5 + $0x78] sm:$0xff]  ;;  %v636_v41 = vpack.c.bf16 %v195_v37, %v194_v36  ;;  %v197_v43 = vld [vmem:[#allocation7 + $0x68] sm:$0xff]  ;;  %v198_v47 = vld [vmem:[#allocation7 + $0x70] sm:$0xff] }
  0x54   :  { %623 = vmatpush3.bf16.msra.mxu1 %v620_v17  ;;  %v612_v44 = vpack.c.bf16 %v99_v40, %v98_v39  ;;  %v640_v45 = vpack.c.bf16 %v197_v43, %v196_v42  ;;  %v83_v46 = vld [vmem:[#allocation2 + $0x8] sm:$0xff]  ;;  %v284_v50 = vld [vmem:[#allocation8] sm:$0xff]  ;;  %v285_v51 = vld [vmem:[#allocation8 + $0x8] sm:$0xff]  ;;  %vm384_vm0 = vcmp.ge.s32.totalorder %v383_v25, 16  ;;  %vm385_vm1 = vcmp.lt.s32.totalorder %v383_v25, 48 }
  0x55   :  { %595 = vmatpush3.bf16.msra.mxu0 %v592_v8  ;;  %625 = vmatprep.subr.bf16.mxu1 %v624_v23  ;;  %v199_v48 = vld [vmem:[#allocation7 + $0x78] sm:$0xff]  ;;  %v286_v52 = vld [vmem:[#allocation8 + $0x10] sm:$0xff]  ;;  %v648_v53 = vpack.c.bf16 %v285_v51, %v284_v50  ;;  %v288_v56 = vld [vmem:[#allocation8 + $0x20] sm:$0xff] }
  0x56   :  { %597 = vmatprep.subr.bf16.mxu0 %v596_v20  ;;  %v644_v49 = vpack.c.bf16 %v199_v48, %v198_v47  ;;  %v287_v54 = vld [vmem:[#allocation8 + $0x18] sm:$0xff]  ;;  %v289_v57 = vld [vmem:[#allocation8 + $0x28] sm:$0xff]  ;;  %v290_v59 = vld [vmem:[#allocation8 + $0x30] sm:$0xff] }
  0x57   :  { %v652_v55 = vpack.c.bf16 %v287_v54, %v286_v52  ;;  %v656_v58 = vpack.c.bf16 %v289_v57, %v288_v56  ;;  %v291_v60 = vld [vmem:[#allocation8 + $0x38] sm:$0xff]  ;;  %v292_v62 = vld [vmem:[#allocation8 + $0x40] sm:$0xff]  ;;  %v293_v63 = vld [vmem:[#allocation8 + $0x48] sm:$0xff] }
  0x58   :  { %627 = vmatpush3.bf16.msra.mxu1 %v624_v23  ;;  %v660_v61 = vpack.c.bf16 %v291_v60, %v290_v59  ;;  %v664_v0 = vpack.c.bf16 %v293_v63, %v292_v62  ;;  %v294_v1 = vld [vmem:[#allocation8 + $0x50] sm:$0xff]  ;;  %v295_v2 = vld [vmem:[#allocation8 + $0x58] sm:$0xff]  ;;  %v296_v4 = vld [vmem:[#allocation8 + $0x60] sm:$0xff] }
  0x59   :  { %599 = vmatpush3.bf16.msra.mxu0 %v596_v20  ;;  %629 = vmatprep.subr.bf16.mxu1 %v628_v29  ;;  %v668_v3 = vpack.c.bf16 %v295_v2, %v294_v1  ;;  %v297_v5 = vld [vmem:[#allocation8 + $0x68] sm:$0xff]  ;;  %v422_v7 = vld [vmem:[%s956_s2] ss:$0 sm:$0xff]  ;;  %v299_v15 = vld [vmem:[#allocation8 + $0x78] sm:$0xff] }
  0x5a   :  { %601 = vmatprep.subr.bf16.mxu0 %v600_v26  ;;  %v672_v6 = vpack.c.bf16 %v297_v5, %v296_v4  ;;  %v298_v14 = vld [vmem:[#allocation8 + $0x70] sm:$0xff]  ;;  %vm386_vm2 = vmand %vm384_vm0, %vm385_vm1 }
  0x5b   :  { %v676_v16 = vpack.c.bf16 %v299_v15, %v298_v14  ;;  %v423_v17 = vld [vmem:[%s958_s4] ss:$0 sm:$0xff]  ;;  %s815_s4 = smov [#allocation10]  }
  0x5c   :  { %631 = vmatpush3.bf16.msra.mxu1 %v628_v29 }
  0x5d   :  { %603 = vmatpush3.bf16.msra.mxu0 %v600_v26  ;;  %633 = vmatprep.subr.bf16.mxu1 %v632_v35  ;;  %v424_v26 = vld [vmem:[%s960_s6] ss:$0 sm:$0xff]  ;;  %s408_s6 = sshll.u32 %s815_s4, 4  ;;  %s409_s6 = int_to_ptr.vmem [resolvable:$true] %s408_s6 }
  0x5e   :  { %605 = vmatprep.subr.bf16.mxu0 %v604_v32  ;;  %s779_s8 = scalar_lea.vmem %s409_s6, 256  ;;  %p784_p5 = scmp.lt.s32.totalorder %s409_s6, %s409_s6 }
  0x5f   :  { %p780_p4 = scmp.ne.s32.totalorder %s409_s6, %s779_s8  ;;  %p785_p6 = scmp.lt.s32.totalorder %s779_s8, %s779_s8 }
  0x60   :  { %635 = vmatpush3.bf16.msra.mxu1 %v632_v35 }
  0x61   :  { %607 = vmatpush3.bf16.msra.mxu0 %v604_v32  ;;  %637 = vmatprep.subr.bf16.mxu1 %v636_v41  ;;  %p786_p7 = por %p785_p6, %p784_p5 }
  0x62   :  { %609 = vmatprep.subr.bf16.mxu0 %v608_v38 }
  0x63   :  { %p787_p8 = pnand %p786_p7, %p780_p4 }
  0x64   :  { %639 = vmatpush3.bf16.msra.mxu1 %v636_v41 }
  0x65   :  { %611 = vmatpush3.bf16.msra.mxu0 %v608_v38  ;;  %641 = vmatprep.subr.bf16.mxu1 %v640_v45 }
  0x66   :  { %613 = vmatprep.subr.bf16.mxu0 %v612_v44 }
  0x68   :  { %643 = vmatpush3.bf16.msra.mxu1 %v640_v45 }
  0x69   :  { %615 = vmatpush3.bf16.msra.mxu0 %v612_v44  ;;  %645 = vmatprep.subr.bf16.mxu1 %v644_v49 }
  0x6a   :  { %649 = vmatprep.subr.bf16.mxu0 %v648_v53 }
  0x6c   :  { %512 = vmatmul.mubr.f32.vlgmr.msra.gmra.mrb[0].mxu0 %v83_v46  ;;  %647 = vmatpush3.bf16.msra.mxu1 %v644_v49 }
  0x6d   :  { %651 = vmatpush3.bf16.msra.mxu0 %v648_v53 }
  0x6e   :  { %653 = vmatprep.subr.bf16.mxu0 %v652_v55 }
  0x71   :  { %655 = vmatpush3.bf16.msra.mxu0 %v652_v55 }
  0x72   :  { %657 = vmatprep.subr.bf16.mxu0 %v656_v58 }
  0x75   :  { %659 = vmatpush3.bf16.msra.mxu0 %v656_v58 }
  0x76   :  { %661 = vmatprep.subr.bf16.mxu0 %v660_v61 }
  0x79   :  { %663 = vmatpush3.bf16.msra.mxu0 %v660_v61 }
  0x7a   :  { %665 = vmatprep.subr.bf16.mxu0 %v664_v0 }
  0x7d   :  { %667 = vmatpush3.bf16.msra.mxu0 %v664_v0 }
  0x7e   :  { %669 = vmatprep.subr.bf16.mxu0 %v668_v3 }
  0x81   :  { %671 = vmatpush3.bf16.msra.mxu0 %v668_v3 }
  0x82   :  { %673 = vmatprep.subr.bf16.mxu0 %v672_v6 }
  0x85   :  { %675 = vmatpush3.bf16.msra.mxu0 %v672_v6 }
  0x86   :  { %677 = vmatprep.subr.bf16.mxu0 %v676_v16 }
  0x89   :  { %679 = vmatpush3.bf16.msra.mxu0 %v676_v16 }
 0x13f   :  { %v513_v8 = vpop.f32.mrb[0].mxu0 }
 0x140   :  { %v179_v9 = vadd.f32 %v513_v8, %v422_v7  ;;  %v173_v10 = vpop.f32.mrb[1].mxu0 }
 0x141   :  { %v174_v11 = vadd.f32 %v422_v7, %v173_v10 }
 0x142   :  { %v183_v13 = vmax.f32 %v179_v9, 0.0 }
 0x143   :  { %v182_v12 = vmax.f32 %v174_v11, 0.0 }
 0x145   :  { %546 = vmatprep.mubr.f32.mxu1 %v182_v12 }
 0x146   :  { %547 = vmatmul.mubr.f32.vlgmr.msra.gmra.mrb[0].mxu1 %v183_v13 }
 0x219   :  { %v548_v18 = vpop.f32.mrb[0].mxu1 }
 0x21a   :  { %v279_v19 = vadd.f32 %v548_v18, %v423_v17  ;;  %v273_v20 = vpop.f32.mrb[1].mxu1 }
 0x21b   :  { %v274_v21 = vadd.f32 %v423_v17, %v273_v20 }
 0x21c   :  { %v283_v23 = vmax.f32 %v279_v19, 0.0 }
 0x21d   :  { %v282_v22 = vmax.f32 %v274_v21, 0.0 }
 0x21f   :  { %581 = vmatprep.mubr.f32.mxu0 %v282_v22 }
 0x220   :  { %582 = vmatmul.mubr.f32.vlgmr.msra.gmra.mrb[2].mxu0 %v283_v23 }
 0x2f3   :  { %v583_v27 = vpop.f32.mrb[2].mxu0 }
 0x2f4   :  { %v373_v28 = vpop.f32.mrb[3].mxu0  ;;  %v379_v29 = vadd.f32 %v583_v27, %v424_v26 }
 0x2f5   :  { %v374_v30 = vadd.f32 %v424_v26, %v373_v28 }
 0x2f6   :  { %v388_v33 = vmul.f32 %v379_v29, %v379_v29 }
 0x2f7   :  { %v387_v31 = vmul.f32 %v374_v30, %v374_v30 }
 0x2f8   :  { %v390_v34 = vsel %vm386_vm2, %v388_v33, 0.0 }
 0x2f9   :  { %v389_v32 = vsel %vm386_vm2, %v387_v31, 0.0 }
 0x2fa   :  { %391 = vadd.xlane.f32.xlu0 %v389_v32 }
 0x2fe   :  { %393 = vadd.xlane.f32.xlu0 %v390_v34 }
 0x387   :  { %v392_v35 = vpop.xlane.xlu0 %391 }
 0x388   :  { %v395_v36 = vmax.f32 %v392_v35, 1e-24 }
 0x38a   :  { %687 = vrsqrt.f32 %v395_v36 }
 0x38b   :  { %v394_v37 = vpop.xlane.xlu0 %393 }
 0x38c   :  { %v396_v38 = vmax.f32 %v394_v37, 1e-24 }
 0x38e   :  { %689 = vrsqrt.f32 %v396_v38 }
 0x394   :  { %v688_v39 = vpop.eup %687 }
 0x395   :  { %v399_v40 = vmul.f32 %v688_v39, %v374_v30 }
 0x397   :  { %401 = vst [vmem:[#allocation10] sm:$0xff] %v399_v40 }
 0x398   :  { %v690_v41 = vpop.eup %689 }
 0x399   :  { %v400_v42 = vmul.f32 %v690_v41, %v379_v29 }
 0x39b   :  { %402 = vst [vmem:[#allocation10 + $0x8] sm:$0xff] %v400_v42 }
 0x39c   :  { %790 = shalt.err (!%p787_p8)
}
 0x39d   :  { %s791_s11 = scalar_lea.hbm %s961_s7, 256 }
 0x39e   :  { %p792_p9 = scmp.ne.s32.totalorder %s961_s7, %s791_s11  ;;  %p795_p10 = scmp.lt.u32.totalorder %s791_s11, %s961_s7 }
 0x3a0   :  { %p797_p11 = pnand %p795_p10, %p792_p9 }
 0x3a2   :  { %800 = shalt.err (!%p797_p11)
}
 0x3a3   :  { %414 = dma.vmem_to_hbm [thread:$0]  %s409_s6, 256, %s961_s7, [#allocation4], %s811_s13, %s811_s13, %s812_s14  }
 0x3a4   :  { %807 = dma.done.wait [#allocation4], 256  }
 0x3a5   :  { %808 = vsyncadd [#allocation4], 4294967040 }
 0x3a6   :  { %418 = vsyncpa [#allocation3], 1 }
 0x3a7   :  { %419 = vsyncpa [#allocation6], 1 }
 0x3a8   :  { %420 = vsyncpa [#allocation9], 1 }
 0x3a9   :  { %421 = vsyncpa [#allocation4], 1 }

</bundles_post_ra>
